<compile_context>
chip_gen: v7x
topology: tpu7x:2x2x1
jax: 0.10.0
libtpu: 0.0.40
codegen_flags: <defaults>
</compile_context>

<pallas_src>
import jax
import jax.numpy as jnp
from jax.experimental import pallas as pl
from jax.experimental.pallas import tpu as pltpu

# params layout (SMEM, float32[15]):
#   0: w01  1: b01   2: w10  3: b10   4: w12  5: b12
#   6: w21  7: b21   8: w23  9: b23  10: w32 11: b32
#  12: alphaRec  13: betaFw  14: lambdaBw
W01, B01, W10, B10, W12, B12 = 0, 1, 2, 3, 4, 5
W21, B21, W23, B23, W32, B32 = 6, 7, 8, 9, 10, 11
AREC, BFW, LBW = 12, 13, 14

LANE = 128
SUBLANE = 8
# Per-mode tile caps (rows). Double-buffered VMEM footprint at cap:
#   forward  5 streams x 2 x 1   MiB = 10 MiB   (< 16 MiB v5e scoped default)
#   recon    7 streams x 2 x 0.5 MiB =  7 MiB
#   full    11 streams x 2 x 0.5 MiB = 11 MiB
_TILE_CAP = {"forward": 2048, "reconstruction": 1024, "full": 1024}
_PALLAS_MIN_ELEMS = 65536   # below this, XLA's fused elementwise path wins


def _round_up(x, m):
    return ((x + m - 1) // m) * m


def _sigmoid(x):
    # single-EUP sigmoid: sigmoid(x) = 0.5 * (tanh(x/2) + 1)
    return 0.5 * (jnp.tanh(0.5 * x) + 1.0)


# ----------------------------- mode == 'forward' -----------------------------
def _fwd_kernel(p_ref, a0_ref, out_ref, a1_ref, a2_ref, a3_ref):
    w01, b01 = p_ref[W01], p_ref[B01]
    w12, b12 = p_ref[W12], p_ref[B12]
    w23, b23 = p_ref[W23], p_ref[B23]
    a0 = a0_ref[...]
    a1 = jnp.tanh(w01 * a0 + b01)
    a2 = jnp.tanh(w12 * a1 + b12)
    a3 = jnp.tanh(w23 * a2 + b23)
    a1_ref[...] = a1
    a2_ref[...] = a2
    a3_ref[...] = a3
    out_ref[...] = _sigmoid(a3)


# ------------------------- mode == 'reconstruction' --------------------------
def _rec_kernel(p_ref, a1_ref, a2_ref, a3_ref,
                out_ref, a0o_ref, a1o_ref, a2o_ref):
    w10, b10 = p_ref[W10], p_ref[B10]
    w21, b21 = p_ref[W21], p_ref[B21]
    w32, b32 = p_ref[W32], p_ref[B32]
    a1 = a1_ref[...]
    a2 = a2_ref[...]
    a3 = a3_ref[...]
    a0o_ref[...] = jnp.tanh(w10 * a1 + b10)
    a1o_ref[...] = jnp.tanh(w21 * a2 + b21)
    a2o_ref[...] = jnp.tanh(w32 * a3 + b32)
    out_ref[...] = _sigmoid(a3)


# ------------------------------ mode == 'full' --------------------------------
def _full_kernel(p_ref, s_ref, a0_ref, a1_ref, a2_ref, a3_ref,
                 out_ref, a1o_ref, a2o_ref, a3o_ref, r0_ref, r1_ref, r2_ref):
    w01, b01 = p_ref[W01], p_ref[B01]
    w10, b10 = p_ref[W10], p_ref[B10]
    w12, b12 = p_ref[W12], p_ref[B12]
    w21, b21 = p_ref[W21], p_ref[B21]
    w23, b23 = p_ref[W23], p_ref[B23]
    w32, b32 = p_ref[W32], p_ref[B32]
    a_rec, b_fw, l_bw = p_ref[AREC], p_ref[BFW], p_ref[LBW]
    two_over_n, batchf = s_ref[0], s_ref[1]   # 2/N (MSE mean), true batch size

    # scalars formed once per kernel body (no per-element splats re-derived)
    arec_b = a_rec * batchf
    keep = 1.0 - b_fw - l_bw
    keep3 = 1.0 - b_fw
    c10 = two_over_n * w10
    c21 = two_over_n * w21
    c32 = two_over_n * w32

    a0 = a0_ref[...]
    a1 = a1_ref[...]
    a2 = a2_ref[...]
    a3 = a3_ref[...]

    # shared linear terms (reused by gradients AND backward tanh terms)
    lin10 = w10 * a1 + b10
    lin21 = w21 * a2 + b21
    lin32 = w32 * a3 + b32

    # analytic torch.autograd.grad(MSE(fc(x), target), x)
    r0 = c10 * (lin10 - a0)
    r1 = c21 * (lin21 - a1)
    r2 = c32 * (lin32 - a2)

    bw1 = jnp.tanh(lin21)
    bw2 = jnp.tanh(lin32)

    a1n = b_fw * jnp.tanh(w01 * a0 + b01) + keep * a1 + l_bw * bw1 - arec_b * r0
    a2n = b_fw * jnp.tanh(w12 * a1n + b12) + keep * a2 + l_bw * bw2 - arec_b * r1
    a3n = b_fw * jnp.tanh(w23 * a2n + b23) + keep3 * a3 - arec_b * r2

    a1o_ref[...] = a1n
    a2o_ref[...] = a2n
    a3o_ref[...] = a3n
    r0_ref[...] = r0
    r1_ref[...] = r1
    r2_ref[...] = r2
    out_ref[...] = _sigmoid(a3n)


# ----------------------------- layout plumbing --------------------------------
def _to_dense(x, rows):
    """(batch,1) -> (rows,128). Free reshape when batch == rows*128."""
    flat = jnp.asarray(x, jnp.float32).reshape(-1)
    if flat.shape[0] == rows * LANE:
        return flat.reshape(rows, LANE)          # row-major: no data movement
    return jnp.pad(flat, (0, rows * LANE - flat.shape[0])).reshape(rows, LANE)


def _from_dense(x2d, batch):
    """(rows,128) -> (batch,1). Free reshape when sizes match."""
    if x2d.size == batch:
        return x2d.reshape(batch, 1)
    return x2d.reshape(-1)[:batch].reshape(batch, 1)


def _pick_tile(rows, cap):
    # Biggest tile that (a) fits the per-mode VMEM cap and (b) leaves >= 2
    # grid steps whenever rows >= 16 so both v7x TensorCores get work.
    half = _round_up(max(1, pl.cdiv(rows, 2)), SUBLANE)
    return max(SUBLANE, min(cap, half))


# ------------------------------ pallas dispatch --------------------------------
def _pallas_dense(params, dense, mode, true_batch):
    rows = dense[0].shape[0]
    tile = _pick_tile(rows, _TILE_CAP[mode])
    grid = (pl.cdiv(rows, tile),)     # ragged last block is masked by Pallas

    blk = pl.BlockSpec((tile, LANE), lambda i: (i, 0))
    smem = pl.BlockSpec(memory_space=pltpu.MemorySpace.SMEM)
    act = jax.ShapeDtypeStruct((rows, LANE), jnp.float32)
    cparams = pltpu.CompilerParams(dimension_semantics=("parallel",))
    n = rows * LANE

    if mode == "forward":
        cost = pl.CostEstimate(flops=10 * n, transcendentals=4 * n,
                               bytes_accessed=5 * n * 4)
        return pl.pallas_call(
            _fwd_kernel, out_shape=(act,) * 4,
            grid_spec=pltpu.PrefetchScalarGridSpec(
                num_scalar_prefetch=0, grid=grid,
                in_specs=[smem, blk], out_specs=(blk,) * 4),
            compiler_params=cparams, cost_estimate=cost,
        )(params, dense[0])

    if mode == "reconstruction":
        cost = pl.CostEstimate(flops=10 * n, transcendentals=4 * n,
                               bytes_accessed=7 * n * 4)
        return pl.pallas_call(
            _rec_kernel, out_shape=(act,) * 4,
            grid_spec=pltpu.PrefetchScalarGridSpec(
                num_scalar_prefetch=0, grid=grid,
                in_specs=[smem, blk, blk, blk], out_specs=(blk,) * 4),
            compiler_params=cparams, cost_estimate=cost,
        )(params, *dense)

    # mode == "full": pass normalisation scalars via SMEM (no Python-float
    # baking into the trace).
    scal = jnp.array([2.0 / float(true_batch), float(true_batch)],
                     dtype=jnp.float32)
    cost = pl.CostEstimate(flops=36 * n, transcendentals=6 * n,
                           bytes_accessed=11 * n * 4)
    return pl.pallas_call(
        _full_kernel, out_shape=(act,) * 7,
        grid_spec=pltpu.PrefetchScalarGridSpec(
            num_scalar_prefetch=0, grid=grid,
            in_specs=[smem, smem, blk, blk, blk, blk], out_specs=(blk,) * 7),
        compiler_params=cparams, cost_estimate=cost,
    )(params, scal, *dense)


# --------------------------- lane-dense end-to-end API --------------------------
def unidim_forward_dense(params, a0d, a1d, a2d, a3d, batch, mode="forward"):
    """Inputs/outputs stay in the lane-dense (rows,128) slab layout — zero
    wrapper copies.  `batch` is the true element count (MSE normalisation)."""
    assert mode in ("forward", "reconstruction", "full")
    if mode == "forward":
        out, a1n, a2n, a3n = _pallas_dense(params, (a0d,), mode, batch)
        return out, a0d, a1n, a2n, a3n, 1, 2, 3
    if mode == "reconstruction":
        out, a0n, a1n, a2n = _pallas_dense(params, (a1d, a2d, a3d), mode, batch)
        return out, a0n, a1n, a2n, a3d, 1, 2, 3
    out, a1n, a2n, a3n, r0, r1, r2 = _pallas_dense(
        params, (a0d, a1d, a2d, a3d), mode, batch)
    return out, a0d, a1n, a2n, a3n, r0, r1, r2


# ----------------------- pure-JAX reference / fallback -------------------------
def _ref_forward_all(params, a0, a1, a2, a3, mode):
    w01, b01 = params[W01], params[B01]
    w10, b10 = params[W10], params[B10]
    w12, b12 = params[W12], params[B12]
    w21, b21 = params[W21], params[B21]
    w23, b23 = params[W23], params[B23]
    w32, b32 = params[W32], params[B32]
    a_rec, b_fw, l_bw = params[AREC], params[BFW], params[LBW]

    if mode == "forward":
        a1 = jnp.tanh(w01 * a0 + b01)
        a2 = jnp.tanh(w12 * a1 + b12)
        a3 = jnp.tanh(w23 * a2 + b23)
        recs = (1, 2, 3)
    elif mode == "reconstruction":
        a0 = jnp.tanh(w10 * a1 + b10)
        a1 = jnp.tanh(w21 * a2 + b21)
        a2 = jnp.tanh(w32 * a3 + b32)
        recs = (1, 2, 3)
    else:
        batch = a0.shape[0]
        n = a0.shape[0] * a0.shape[1]
        r0 = (2.0 / n) * w10 * (w10 * a1 + b10 - a0)
        r1 = (2.0 / n) * w21 * (w21 * a2 + b21 - a1)
        r2 = (2.0 / n) * w32 * (w32 * a3 + b32 - a2)
        a1 = (b_fw * jnp.tanh(w01 * a0 + b01) + (1 - b_fw - l_bw) * a1
              + l_bw * jnp.tanh(w21 * a2 + b21) - a_rec * batch * r0)
        a2 = (b_fw * jnp.tanh(w12 * a1 + b12) + (1 - b_fw - l_bw) * a2
              + l_bw * jnp.tanh(w32 * a3 + b32) - a_rec * batch * r1)
        a3 = (b_fw * jnp.tanh(w23 * a2 + b23) + (1 - b_fw) * a3
              - a_rec * batch * r2)
        recs = (r0, r1, r2)
    out = jax.nn.sigmoid(a3)
    return (out, a0, a1, a2, a3) + recs


# --------------------------------- wrapper ------------------------------------
def unidim_forward(params, a0, a1, a2, a3, mode="forward", use_pallas=None):
    assert mode in ("forward", "reconstruction", "full")
    batch = a0.shape[0]

    if use_pallas is None:
        use_pallas = batch >= _PALLAS_MIN_ELEMS
    if not use_pallas:
        # Small inputs: XLA's fused elementwise path beats Pallas launch cost.
        return _ref_forward_all(params, a0, a1, a2, a3, mode)

    if batch % LANE == 0:
        rows = batch // LANE                       # zero-copy reshape path
    else:
        rows = _round_up(pl.cdiv(batch, LANE), SUBLANE)   # pad path

    if mode == "forward":
        out, a1n, a2n, a3n = _pallas_dense(params, (_to_dense(a0, rows),),
                                           mode, batch)
        return (_from_dense(out, batch), a0,
                _from_dense(a1n, batch), _from_dense(a2n, batch),
                _from_dense(a3n, batch), 1, 2, 3)

    if mode == "reconstruction":
        dense = (_to_dense(a1, rows), _to_dense(a2, rows), _to_dense(a3, rows))
        out, a0n, a1n, a2n = _pallas_dense(params, dense, mode, batch)
        return (_from_dense(out, batch), _from_dense(a0n, batch),
                _from_dense(a1n, batch), _from_dense(a2n, batch),
                a3, 1, 2, 3)

    # mode == "full"
    dense = tuple(_to_dense(x, rows) for x in (a0, a1, a2, a3))
    out, a1n, a2n, a3n, r0, r1, r2 = _pallas_dense(params, dense, mode, batch)
    return (_from_dense(out, batch), a0,
            _from_dense(a1n, batch), _from_dense(a2n, batch),
            _from_dense(a3n, batch),
            _from_dense(r0, batch), _from_dense(r1, batch),
            _from_dense(r2, batch))


def init_params(key, alphaRec=0.01, betaFw=0.33, lambdaBw=0.33):
    # nn.Linear(1,1): weight & bias ~ U(-1/sqrt(fan_in), 1/sqrt(fan_in)) = U(-1, 1)
    keys = jax.random.split(key, 12)
    wb = jnp.stack(
        [jax.random.uniform(k, (), minval=-1.0, maxval=1.0) for k in keys]
    ).astype(jnp.float32)
    hyper = jnp.array([alphaRec, betaFw, lambdaBw], dtype=jnp.float32)
    return jnp.concatenate([wb, hyper])


if __name__ == "__main__":
    key = jax.random.PRNGKey(0)
    kp, k0, k1, k2, k3 = jax.random.split(key, 5)

    params = init_params(kp)
    fwd = jax.jit(unidim_forward, static_argnames=("mode", "use_pallas"))

    # batch multiple of 128 -> zero-copy lane-dense path, grid >= 2 steps
    batch = 2048
    a0 = jax.random.normal(k0, (batch, 1), dtype=jnp.float32)
    a1 = jax.random.normal(k1, (batch, 1), dtype=jnp.float32)
    a2 = jax.random.normal(k2, (batch, 1), dtype=jnp.float32)
    a3 = jax.random.normal(k3, (batch, 1), dtype=jnp.float32)

    for mode in ("forward", "reconstruction", "full"):
        got = fwd(params, a0, a1, a2, a3, mode=mode, use_pallas=True)
        jax.block_until_ready(got[0])
        want = _ref_forward_all(params, a0, a1, a2, a3, mode)
        for g, w in zip(got, want):
            if isinstance(g, int):
                assert g == w, mode
            else:
                assert jnp.allclose(g, w, atol=1e-5), mode

    # non-multiple-of-128 batch exercises the pad / slice-back path
    b2 = 300
    a0s = jax.random.normal(k0, (b2, 1), dtype=jnp.float32)
    a1s = jax.random.normal(k1, (b2, 1), dtype=jnp.float32)
    a2s = jax.random.normal(k2, (b2, 1), dtype=jnp.float32)
    a3s = jax.random.normal(k3, (b2, 1), dtype=jnp.float32)
    got = fwd(params, a0s, a1s, a2s, a3s, mode="full", use_pallas=True)
    jax.block_until_ready(got[0])
    want = _ref_forward_all(params, a0s, a1s, a2s, a3s, mode="full")
    for g, w in zip(got, want):
        assert jnp.allclose(g, w, atol=1e-5), "padded full mode"

    # lane-dense end-to-end API (no wrapper copies at all)
    rows = batch // LANE
    dense_in = tuple(x.reshape(rows, LANE) for x in (a0, a1, a2, a3))
    out_d = unidim_forward_dense(params, *dense_in, batch=batch, mode="full")
    jax.block_until_ready(out_d[0])
    want = _ref_forward_all(params, a0, a1, a2, a3, "full")
    for g, w in zip(out_d, want):
        if not isinstance(g, int):
            assert jnp.allclose(g.reshape(batch, 1), w, atol=1e-5), "dense full"

    print("KERNEL_OK")
</pallas_src>

<mosaic_0001>
module attributes {stable_mosaic.version = 11 : i64} {
  func.func @_fwd_kernel(%arg0: i32, %arg1: memref<15xf32, #tpu.memory_space<smem>>, %arg2: memref<8x128xf32, #tpu.memory_space<vmem>>, %arg3: memref<8x128xf32, #tpu.memory_space<vmem>>, %arg4: memref<8x128xf32, #tpu.memory_space<vmem>>, %arg5: memref<8x128xf32, #tpu.memory_space<vmem>>, %arg6: memref<8x128xf32, #tpu.memory_space<vmem>>) attributes {dimension_semantics = [#tpu.dimension_semantics<parallel>], iteration_bounds = array<i64: 2>, scalar_prefetch = 0 : i64, scratch_operands = 0 : i64, tpu.core_type = #tpu.core_type<tc>, window_params = [{transform_indices = @transform_0, window_bounds = array<i64: 15>}, {transform_indices = @transform_1, window_bounds = array<i64: 8, 128>}, {transform_indices = @transform_2, window_bounds = array<i64: 8, 128>}, {transform_indices = @transform_3, window_bounds = array<i64: 8, 128>}, {transform_indices = @transform_4, window_bounds = array<i64: 8, 128>}, {transform_indices = @transform_5, window_bounds = array<i64: 8, 128>}]} {
    %c0 = arith.constant 0 : index
    %0 = memref.load %arg1[%c0] : memref<15xf32, #tpu.memory_space<smem>>
    %c1 = arith.constant 1 : index
    %1 = memref.load %arg1[%c1] : memref<15xf32, #tpu.memory_space<smem>>
    %c4 = arith.constant 4 : index
    %2 = memref.load %arg1[%c4] : memref<15xf32, #tpu.memory_space<smem>>
    %c5 = arith.constant 5 : index
    %3 = memref.load %arg1[%c5] : memref<15xf32, #tpu.memory_space<smem>>
    %c8 = arith.constant 8 : index
    %4 = memref.load %arg1[%c8] : memref<15xf32, #tpu.memory_space<smem>>
    %c9 = arith.constant 9 : index
    %5 = memref.load %arg1[%c9] : memref<15xf32, #tpu.memory_space<smem>>
    %c0_0 = arith.constant 0 : index
    %c0_1 = arith.constant 0 : index
    %6 = vector.load %arg2[%c0_0, %c0_1] : memref<8x128xf32, #tpu.memory_space<vmem>>, vector<8x128xf32>
    %7 = vector.broadcast %0 : f32 to vector<8x128xf32>
    %8 = arith.mulf %7, %6 : vector<8x128xf32>
    %9 = vector.broadcast %1 : f32 to vector<8x128xf32>
    %10 = arith.addf %8, %9 : vector<8x128xf32>
    %11 = math.tanh %10 : vector<8x128xf32>
    %12 = vector.broadcast %2 : f32 to vector<8x128xf32>
    %13 = arith.mulf %12, %11 : vector<8x128xf32>
    %14 = vector.broadcast %3 : f32 to vector<8x128xf32>
    %15 = arith.addf %13, %14 : vector<8x128xf32>
    %16 = math.tanh %15 : vector<8x128xf32>
    %17 = vector.broadcast %4 : f32 to vector<8x128xf32>
    %18 = arith.mulf %17, %16 : vector<8x128xf32>
    %19 = vector.broadcast %5 : f32 to vector<8x128xf32>
    %20 = arith.addf %18, %19 : vector<8x128xf32>
    %21 = math.tanh %20 : vector<8x128xf32>
    %c0_2 = arith.constant 0 : index
    %c0_3 = arith.constant 0 : index
    %22 = vector.load %arg4[%c0_2, %c0_3] : memref<8x128xf32, #tpu.memory_space<vmem>>, vector<8x128xf32>
    tpu.vector_store %arg4[%c0_2, %c0_3], %11 {strides = array<i32>} : memref<8x128xf32, #tpu.memory_space<vmem>>, vector<8x128xf32>,
    %c0_4 = arith.constant 0 : index
    %c0_5 = arith.constant 0 : index
    %23 = vector.load %arg5[%c0_4, %c0_5] : memref<8x128xf32, #tpu.memory_space<vmem>>, vector<8x128xf32>
    tpu.vector_store %arg5[%c0_4, %c0_5], %16 {strides = array<i32>} : memref<8x128xf32, #tpu.memory_space<vmem>>, vector<8x128xf32>,
    %c0_6 = arith.constant 0 : index
    %c0_7 = arith.constant 0 : index
    %24 = vector.load %arg6[%c0_6, %c0_7] : memref<8x128xf32, #tpu.memory_space<vmem>>, vector<8x128xf32>
    tpu.vector_store %arg6[%c0_6, %c0_7], %21 {strides = array<i32>} : memref<8x128xf32, #tpu.memory_space<vmem>>, vector<8x128xf32>,
    %cst = arith.constant 5.000000e-01 : f32
    %25 = vector.broadcast %cst : f32 to vector<8x128xf32>
    %26 = arith.mulf %25, %21 : vector<8x128xf32>
    %27 = math.tanh %26 : vector<8x128xf32>
    %cst_8 = arith.constant 1.000000e+00 : f32
    %28 = vector.broadcast %cst_8 : f32 to vector<8x128xf32>
    %29 = arith.addf %27, %28 : vector<8x128xf32>
    %cst_9 = arith.constant 5.000000e-01 : f32
    %30 = vector.broadcast %cst_9 : f32 to vector<8x128xf32>
    %31 = arith.mulf %30, %29 : vector<8x128xf32>
    %c0_10 = arith.constant 0 : index
    %c0_11 = arith.constant 0 : index
    %32 = vector.load %arg3[%c0_10, %c0_11] : memref<8x128xf32, #tpu.memory_space<vmem>>, vector<8x128xf32>
    tpu.vector_store %arg3[%c0_10, %c0_11], %31 {strides = array<i32>} : memref<8x128xf32, #tpu.memory_space<vmem>>, vector<8x128xf32>,
    return
  }
  func.func @transform_0(%arg0: i32) -> i32 {
    %c0_i32 = arith.constant 0 : i32
    %c0_i32_0 = arith.constant 0 : i32
    return %c0_i32 : i32
  }
  func.func @transform_1(%arg0: i32) -> (i32, i32) {
    %c0_i32 = arith.constant 0 : i32
    %c0_i32_0 = arith.constant 0 : i32
    return %arg0, %c0_i32 : i32, i32
  }
  func.func @transform_2(%arg0: i32) -> (i32, i32) {
    %c0_i32 = arith.constant 0 : i32
    %c0_i32_0 = arith.constant 0 : i32
    return %arg0, %c0_i32 : i32, i32
  }
  func.func @transform_3(%arg0: i32) -> (i32, i32) {
    %c0_i32 = arith.constant 0 : i32
    %c0_i32_0 = arith.constant 0 : i32
    return %arg0, %c0_i32 : i32, i32
  }
  func.func @transform_4(%arg0: i32) -> (i32, i32) {
    %c0_i32 = arith.constant 0 : i32
    %c0_i32_0 = arith.constant 0 : i32
    return %arg0, %c0_i32 : i32, i32
  }
  func.func @transform_5(%arg0: i32) -> (i32, i32) {
    %c0_i32 = arith.constant 0 : i32
    %c0_i32_0 = arith.constant 0 : i32
    return %arg0, %c0_i32 : i32, i32
  }
}

</mosaic_0001>

<bundles_post_ra>
// kernel: unidim_forward.1
= control target key start
LH: loop header
LB: loop body
LE: loop exit
PB: predicated region body
PF: predicated region fallthrough
CT: control target
= control target key end

     0   :  { %11 = vsyncpa [#allocation5], 0  ;;  %s1213_s0 = inlined_call_operand.vmem [shape: f32[15], index: 0, kind: input, shape index: {}]   ;;  %s1214_s1 = inlined_call_operand.hbm [shape: f32[16,128], index: 1, kind: input, shape index: {}]   ;;  %s1215_s2 = inlined_call_operand.hbm [shape: f32[16,128], index: 2, kind: output, shape index: {0}]   ;;  %s1216_s3 = inlined_call_operand.hbm [shape: f32[16,128], index: 3, kind: output, shape index: {1}]   ;;  %s1217_s4 = inlined_call_operand.hbm [shape: f32[16,128], index: 4, kind: output, shape index: {2}]   ;;  %s1218_s5 = inlined_call_operand.hbm [shape: f32[16,128], index: 5, kind: output, shape index: {3}]  }
   0x1   :  { %12 = vsyncpa [#allocation3], 0 }
   0x2   :  { %14 = vsyncpa [#allocation3 + $0x1], 0 }
   0x3   :  { %15 = vsyncpa [#allocation4], 0 }
   0x4   :  { %17 = vsyncpa [#allocation4 + $0x1], 0 }
   0x5   :  { %18 = vsyncpa [#allocation9], 0 }
   0x6   :  { %20 = vsyncpa [#allocation9 + $0x1], 0 }
   0x7   :  { %21 = vsyncpa [#allocation12], 0 }
   0x8   :  { %23 = vsyncpa [#allocation12 + $0x1], 0  ;;  %s908_s18 = smov 0   ;;  %s910_s19 = smov 0  }
   0x9   :  { %s912_s20 = smov 0   ;;  %s914_s21 = smov 0  }
   0xa LB: > { %s929_s22 = sadd.s32 4294967295, %s870_s21   ;;  %s555_s23 = sadd.s32 4294967294, %s870_s21   ;;  %s870_s21 = sphi %s914_s21, %s1239_s21   ;;  %s866_s20 = sphi %s912_s20, %s1238_s20   ;;  %s862_s19 = sphi %s910_s19, %s1237_s19   ;;  %s858_s18 = sphi %s908_s18, %s1236_s18  }
   0xb   : > { %p70_p0 = scmp.ne.s32.totalorder %s862_s19, %s858_s18  ;;  %p1219_p1 = scmp.eq.s32.totalorder %s929_s22, 0 }
   0xc   : > { %p100_p3 = scmp.eq.s32.totalorder %s555_s23, 1  ;;  %p556_p5 = scmp.ge.s32.totalorder %s870_s21, 1 }
   0xd   : > { %p940_p4 = por %p1219_p1, %p70_p0  ;;  %p185_p7 = scmp.lt.s32.totalorder %s870_s21, 3 }
   0xe   : > { %p945_p6 = por %p100_p3, %p70_p0  ;;  %s198_s28 = sshll.u32 %s1213_s0, 4  ;;  %s199_s28 = int_to_ptr.vmem [resolvable:$true] %s198_s28 }
   0xf   : > { %s1222_s24 = scalar_select %p940_p4, 1, 0 }
  0x10   : > { %s1223_s25 = scalar_select %p945_p6, 1, 0 }
  0x11   : > { %p953_p8 = pnand %p556_p5, %p185_p7  ;;  %s961_s30 = sadd.s32 1, %s870_s21  }
  0x12   : > { %s54_s7 = ssub.s32 %s870_s21, %s961_s30  ;;  %s57_s9 = sadd.s32 1, %s866_s20 }
  0x13   : > { %p597_p10 = pneg %p953_p8  ;;  %p971_p12 = scmp.eq.s32.totalorder %s54_s7, 0 }
  0x14   : > { %p64_p13 = scmp.ne.s32.totalorder %s866_s20, %s862_s19  ;;  %s663_s10 = scalar_lea.vmem %s199_s28, 16 }
  0x15   : > { %p965_p11 = pnand %p597_p10, %p1219_p1  ;;  %p664_p0 = scmp.ne.s32.totalorder %s199_s28, %s663_s10 }
  0x16   : > { %p671_p9 = scmp.lt.s32.totalorder %s199_s28, %s199_s28  ;;  %p672_p2 = scmp.lt.s32.totalorder %s663_s10, %s663_s10 }
  0x17   : > { %p665_p3 = pneg %p965_p11 }
  0x18   : > { %p673_p10 = por %p672_p2, %p671_p9 }
  0x19   : > { %p666_p5 = pnand %p665_p3, %p664_p0 }
  0x1b   : > { %p667_p7 = pneg %p666_p5 }
  0x1d   : > { %p674_p1 = pnand %p673_p10, %p667_p7 }
  0x1f   : > { %677 = shalt.err (!%p674_p1)
}
  0x20   : > { %s872_s11 = smov [#allocation2]   ;;  %p65_p2 = scmp.eq.s32.totalorder %s870_s21, 0 }
  0x21   : > { %600 = dma.vmem_to_smem (!%p965_p11), %s199_s28, 16, %s872_s11, [#allocation5]  }
  0x22   : > { %s985_s12 = scalar_select %p971_p12, %s866_s20, %s57_s9  }
  0x23   : > { %p1227_p1 = scmp.eq.s32.totalorder %s929_s22, 1  ;;  %p619_p0 = scmp.lt.s32.totalorder %s870_s21, 2 }
  0x24   : > { %s209_s14 = sand.u32 1, %s866_s20   ;;  %p66_p3 = por %p65_p2, %p64_p13 }
  0x25   : > { %p993_p9 = por %p1227_p1, %p64_p13  ;;  %s559_s15 = sshll.u32 %s209_s14, 3 }
  0x26   : > { %s560_s16 = sshll.u32 %s870_s21, 7  ;;  %s213_s28 = scalar_lea.vmem [#allocation6], %s559_s15 }
  0x27   : > { %s1228_s13 = scalar_select %p993_p9, 1, 0 }
  0x28   : > { %s1006_s27 = scalar_lea.hbm %s1214_s1, %s560_s16  ;;  %s220_s6 = sshll.u32 %s213_s28, 4  ;;  %s1012_s6 = int_to_ptr.vmem [resolvable:$true] %s220_s6 }
  0x29   : > { %p1008_p11 = pnand %p619_p0, %p66_p3  ;;  %s210_s8 = scalar_lea.sflag [#allocation3], %s209_s14 }
  0x2a   : > { %s678_s9 = scalar_lea.hbm %s1006_s27, 128  ;;  %s683_s15 = scalar_lea.hbm %s1214_s1, 256 }
  0x2b   : > { %p679_p12 = scmp.ne.s32.totalorder %s1006_s27, %s678_s9  ;;  %p680_p13 = pneg %p1008_p11 }
  0x2c   : > { %p684_p10 = scmp.lt.u32.totalorder %s1006_s27, %s1214_s1  ;;  %p685_p2 = scmp.lt.u32.totalorder %s683_s15, %s678_s9 }
  0x2d   : > { %p681_p5 = pnand %p680_p13, %p679_p12  ;;  %p687_p0 = scmp.lt.u32.totalorder %s678_s9, %s1006_s27 }
  0x2e   : > { %p686_p1 = por %p685_p2, %p684_p10 }
  0x2f   : > { %p682_p7 = pneg %p681_p5 }
  0x30   : > { %p688_p3 = por %p687_p0, %p686_p1 }
  0x32   : > { %p689_p6 = pnand %p688_p3, %p682_p7 }
  0x34   : > { %692 = shalt.err (!%p689_p6)
}
  0x35   : > { %s693_s14 = scalar_lea.vmem %s1012_s6, 128  ;;  %s873_s26 = smov [#allocation6]  }
  0x36   : > { %p694_p12 = scmp.ne.s32.totalorder %s1012_s6, %s693_s14  ;;  %s698_s28 = sshll.u32 %s873_s26, 4  ;;  %s699_s28 = int_to_ptr.vmem [resolvable:$false] %s698_s28 }
  0x37   : > { %s700_s10 = scalar_lea.vmem %s699_s28, 256  ;;  %p701_p4 = scmp.lt.s32.totalorder %s1012_s6, %s699_s28 }
  0x38   : > { %p696_p5 = pnand %p694_p12, %p680_p13  ;;  %p702_p10 = scmp.lt.s32.totalorder %s700_s10, %s693_s14 }
  0x3a   : > { %p697_p9 = pneg %p696_p5  ;;  %p703_p2 = por %p702_p10, %p701_p4 }
  0x3c   : > { %p704_p1 = pnand %p703_p2, %p697_p9 }
  0x3e   : > { %707 = shalt.err (!%p704_p1)
}
  0x3f   : > { %604 = dma.hbm_to_vmem [thread:$0]  (!%p1008_p11), %s1006_s27, 128, %s1012_s6, %s210_s8  }
  0x40   : > { %229 = sbr.rel (%p953_p8) target bundleno = 194 (0xc2), region = 28  ;;  %p1230_p6 = scmp.eq.s32.totalorder (!%p953_p8), %s929_s22, 0 }
  0x47   : > { %837 = dma.done.wait (%p1230_p6), [#allocation5], 16   ;;  %p1231_p13 = pmov %p1230_p6 }
  0x48   : > { %s1046_s9 = sand.u32 1, %s862_s19   ;;  %p1232_p4 = scmp.ne.s32.totalorder %s1222_s24, 0 }
  0x49   : > { %839 = vsyncadd (%p1231_p13), [#allocation5], 4294967280  ;;  %s1049_s11 = sshll.u32 %s1046_s9, 3  ;;  %s236_s7 = scalar_lea.sflag [#allocation3], %s1046_s9 }
  0x4a   : > { %s239_s27 = scalar_lea.vmem [#allocation6], %s1049_s11 }
  0x4b   : > { %841 = dma.done.wait (%p1232_p4), %s236_s7, 128  }
  0x4c   : > { %843 = vsyncadd (%p1232_p4), %s236_s7, 4294967168 }
  0x4d   : > { %244 = sfence }
  0x4e   : > { %s282_s29 = sld [smem:[#allocation2]]  ;;  %s568_s6 = sld [smem:[#allocation2 + $0x1]]  ;;  %v288_v0 = vld [vmem:[%s239_s27] sm:$0xff] }
  0x4f   : > { %s569_s8 = sld [smem:[#allocation2 + $0x4]]  ;;  %s1057_s15 = sld [smem:[#allocation2 + $0x5]] }
  0x50   : > { %s267_s16 = scalar_lea.vmem [#allocation8], %s1049_s11  ;;  %s317_s17 = sand.u32 1, %s929_s22  }
  0x51   : > { %s354_s24 = sshll.u32 %s267_s16, 4  ;;  %s1062_s14 = sshll.u32 %s929_s22, 7  ;;  %s1064_s24 = int_to_ptr.vmem [resolvable:$true] %s354_s24 }
  0x52   : > { %s1070_s10 = scalar_lea.hbm %s1216_s3, %s1062_s14  ;;  %s1073_s7 = scalar_lea.sflag [#allocation9], %s317_s17 }
  0x53   : > { %s708_s22 = scalar_lea.vmem %s1064_s24, 128  ;;  %p1233_p9 = scmp.ne.s32.totalorder %s1228_s13, 0 }
  0x54   : > { %v289_v1 = vstv %s282_s29  ;;  %v291_v3 = vstv %s568_s6  ;;  %p709_p8 = scmp.ne.s32.totalorder %s1064_s24, %s708_s22  ;;  %s874_s27 = smov [#allocation8]  }
  0x55   : > { %v290_v2 = vmul.f32 %v289_v1, %v288_v0  ;;  %v294_v5 = vstv %s569_s8  ;;  %v296_v7 = vstv %s1057_s15  ;;  %s712_s29 = sshll.u32 %s874_s27, 4  ;;  %s713_s29 = int_to_ptr.vmem [resolvable:$false] %s712_s29 }
  0x56   : > { %p710_p11 = pnand %p709_p8, %p1233_p9  ;;  %s714_s6 = scalar_lea.vmem %s713_s29, 256 }
  0x57   : > { %v292_v4 = vadd.f32 %v291_v3, %v290_v2  ;;  %p715_p0 = scmp.lt.s32.totalorder %s1064_s24, %s713_s29  ;;  %p716_p3 = scmp.lt.s32.totalorder %s714_s6, %s708_s22 }
  0x58   : > { %p711_p7 = pneg %p710_p11 }
  0x59   : > { %655 = vtanh.f32 %v292_v4  ;;  %p717_p12 = por %p716_p3, %p715_p0 }
  0x5b   : > { %p718_p5 = pnand %p717_p12, %p711_p7 }
  0x63   : > { %v656_v6 = vpop.eup %655 }
  0x64   : > { %304 = vst [vmem:[%s267_s16] sm:$0xff] %v656_v6  ;;  %v295_v8 = vmul.f32 %v656_v6, %v294_v5 }
  0x65   : > { %721 = shalt.err (!%p718_p5)
}
  0x66   : > { %s722_s8 = scalar_lea.hbm %s1070_s10, 128  ;;  %s726_s17 = scalar_lea.hbm %s1216_s3, 256 }
  0x67   : > { %p723_p10 = scmp.ne.s32.totalorder %s1070_s10, %s722_s8  ;;  %p727_p6 = scmp.lt.u32.totalorder %s1070_s10, %s1216_s3 }
  0x68   : > { %p728_p13 = scmp.lt.u32.totalorder %s726_s17, %s722_s8  ;;  %p730_p8 = scmp.lt.u32.totalorder %s722_s8, %s1070_s10 }
  0x69   : > { %p724_p2 = pnand %p723_p10, %p1233_p9 }
  0x6a   : > { %p729_p4 = por %p728_p13, %p727_p6 }
  0x6b   : > { %p725_p1 = pneg %p724_p2 }
  0x6c   : > { %p731_p11 = por %p730_p8, %p729_p4 }
  0x6e   : > { %p732_p7 = pnand %p731_p11, %p725_p1 }
  0x70   : > { %735 = shalt.err (!%p732_p7)
}
  0x71   : > { %590 = dma.vmem_to_hbm [thread:$0]  (%p1233_p9), %s1064_s24, 128, %s1070_s10, %s1073_s7   ;;  %v297_v9 = vadd.f32 %v296_v7, %v295_v8 }
  0x72   : > { %s571_s22 = sld [smem:[#allocation2 + $0x8]]  ;;  %s1097_s27 = sld [smem:[#allocation2 + $0x9]] }
  0x73   : > { %657 = vtanh.f32 %v297_v9  ;;  %s274_s29 = scalar_lea.vmem [#allocation10], %s1049_s11  ;;  %s1106_s16 = scalar_lea.hbm %s1217_s4, %s1062_s14 }
  0x74   : > { %s367_s6 = sshll.u32 %s274_s29, 4  ;;  %s875_s10 = smov [#allocation10]   ;;  %s1100_s6 = int_to_ptr.vmem [resolvable:$true] %s367_s6 }
  0x75   : > { %s736_s24 = scalar_lea.vmem %s1100_s6, 128  ;;  %s740_s17 = sshll.u32 %s875_s10, 4  ;;  %s741_s17 = int_to_ptr.vmem [resolvable:$false] %s740_s17 }
  0x76   : > { %p737_p0 = scmp.ne.s32.totalorder %s1100_s6, %s736_s24  ;;  %s742_s26 = scalar_lea.vmem %s741_s17, 256 }
  0x77   : > { %p743_p5 = scmp.lt.s32.totalorder %s1100_s6, %s741_s17  ;;  %p744_p10 = scmp.lt.s32.totalorder %s742_s26, %s736_s24 }
  0x78   : > { %v299_v10 = vstv %s571_s22  ;;  %v301_v12 = vstv %s1097_s27  ;;  %p738_p3 = pnand %p737_p0, %p1233_p9 }
  0x79   : > { %p745_p2 = por %p744_p10, %p743_p5 }
  0x7a   : > { %p739_p12 = pneg %p738_p3 }
  0x7c   : > { %p746_p1 = pnand %p745_p2, %p739_p12 }
  0x7d   : > { %v658_v11 = vpop.eup %657 }
  0x7e   : > { %305 = vst [vmem:[%s274_s29] sm:$0xff] %v658_v11  ;;  %v300_v13 = vmul.f32 %v658_v11, %v299_v10 }
  0x7f   : > { %749 = shalt.err (!%p746_p1)
}
  0x80   : > { %s750_s28 = scalar_lea.hbm %s1106_s16, 128  ;;  %s754_s29 = scalar_lea.hbm %s1217_s4, 256 }
  0x81   : > { %p751_p6 = scmp.ne.s32.totalorder %s1106_s16, %s750_s28  ;;  %p755_p8 = scmp.lt.u32.totalorder %s1106_s16, %s1217_s4 }
  0x82   : > { %p756_p11 = scmp.lt.u32.totalorder %s754_s29, %s750_s28  ;;  %p758_p0 = scmp.lt.u32.totalorder %s750_s28, %s1106_s16 }
  0x83   : > { %p752_p13 = pnand %p751_p6, %p1233_p9 }
  0x84   : > { %p757_p7 = por %p756_p11, %p755_p8 }
  0x85   : > { %p753_p4 = pneg %p752_p13 }
  0x86   : > { %p759_p3 = por %p758_p0, %p757_p7 }
  0x88   : > { %p760_p12 = pnand %p759_p3, %p753_p4 }
  0x8a   : > { %763 = shalt.err (!%p760_p12)
}
  0x8b   : > { %591 = dma.vmem_to_hbm [thread:$0]  (%p1233_p9), %s1100_s6, 128, %s1106_s16, %s1073_s7   ;;  %v302_v14 = vadd.f32 %v301_v12, %v300_v13 }
  0x8c   : > { %s281_s24 = scalar_lea.vmem [#allocation11], %s1049_s11  ;;  %s1138_s28 = scalar_lea.hbm %s1218_s5, %s1062_s14 }
  0x8d   : > { %659 = vtanh.f32 %v302_v14  ;;  %s380_s10 = sshll.u32 %s281_s24, 4  ;;  %s328_s22 = scalar_lea.sflag [#allocation12], %s1046_s9  ;;  %s1132_s10 = int_to_ptr.vmem [resolvable:$true] %s380_s10 }
  0x8e   : > { %s764_s27 = scalar_lea.vmem %s1132_s10, 128  ;;  %s876_s7 = smov [#allocation11]  }
  0x8f   : > { %p765_p5 = scmp.ne.s32.totalorder %s1132_s10, %s764_s27  ;;  %s768_s6 = sshll.u32 %s876_s7, 4  ;;  %s769_s6 = int_to_ptr.vmem [resolvable:$false] %s768_s6 }
  0x90   : > { %s770_s16 = scalar_lea.vmem %s769_s6, 256  ;;  %p771_p1 = scmp.lt.s32.totalorder %s1132_s10, %s769_s6 }
  0x91   : > { %p766_p10 = pnand %p765_p5, %p1233_p9  ;;  %p772_p6 = scmp.lt.s32.totalorder %s770_s16, %s764_s27 }
  0x93   : > { %p767_p2 = pneg %p766_p10  ;;  %p773_p13 = por %p772_p6, %p771_p1 }
  0x95   : > { %p774_p4 = pnand %p773_p13, %p767_p2 }
  0x97   : > { %v660_v15 = vpop.eup %659 }
  0x98   : > { %306 = vst [vmem:[%s281_s24] sm:$0xff] %v660_v15  ;;  %v307_v16 = vmul.f32 0.5, %v660_v15 }
  0x99   : > { %777 = shalt.err (!%p774_p4)
}
  0x9a   : > { %s778_s29 = scalar_lea.hbm %s1138_s28, 128  ;;  %s782_s24 = scalar_lea.hbm %s1218_s5, 256 }
  0x9b   : > { %p779_p8 = scmp.ne.s32.totalorder %s1138_s28, %s778_s29  ;;  %p783_p0 = scmp.lt.u32.totalorder %s1138_s28, %s1218_s5 }
  0x9c   : > { %p784_p3 = scmp.lt.u32.totalorder %s782_s24, %s778_s29  ;;  %p786_p5 = scmp.lt.u32.totalorder %s778_s29, %s1138_s28 }
  0x9d   : > { %p780_p11 = pnand %p779_p8, %p1233_p9 }
  0x9e   : > { %p785_p12 = por %p784_p3, %p783_p0 }
  0x9f   : > { %p781_p7 = pneg %p780_p11 }
  0xa0   : > { %p787_p10 = por %p786_p5, %p785_p12 }
  0xa2   : > { %p788_p2 = pnand %p787_p10, %p781_p7 }
  0xa4   : > { %791 = shalt.err (!%p788_p2)
}
  0xa5   : > { %592 = dma.vmem_to_hbm [thread:$0]  (%p1233_p9), %s1132_s10, 128, %s1138_s28, %s328_s22   ;;  %661 = vtanh.f32 %v307_v16 }
  0xa6   : > { %s260_s27 = scalar_lea.vmem [#allocation7], %s1049_s11  ;;  %s1169_s29 = scalar_lea.hbm %s1215_s2, %s1062_s14 }
  0xa7   : > { %s341_s7 = sshll.u32 %s260_s27, 4  ;;  %s313_s8 = scalar_lea.sflag [#allocation4], %s1046_s9  ;;  %s1163_s7 = int_to_ptr.vmem [resolvable:$true] %s341_s7 }
  0xa8   : > { %s792_s15 = scalar_lea.vmem %s1163_s7, 128  ;;  %s877_s11 = smov [#allocation7]  }
  0xa9   : > { %p793_p1 = scmp.ne.s32.totalorder %s1163_s7, %s792_s15  ;;  %s796_s10 = sshll.u32 %s877_s11, 4  ;;  %s797_s10 = int_to_ptr.vmem [resolvable:$false] %s796_s10 }
  0xaa   : > { %s798_s28 = scalar_lea.vmem %s797_s10, 256  ;;  %p799_p4 = scmp.lt.s32.totalorder %s1163_s7, %s797_s10 }
  0xab   : > { %p794_p6 = pnand %p793_p1, %p1233_p9  ;;  %p800_p8 = scmp.lt.s32.totalorder %s798_s28, %s792_s15 }
  0xad   : > { %p795_p13 = pneg %p794_p6  ;;  %p801_p11 = por %p800_p8, %p799_p4 }
  0xaf   : > { %v662_v17 = vpop.eup %661  ;;  %p802_p7 = pnand %p801_p11, %p795_p13 }
  0xb0   : > { %v309_v18 = vadd.f32 1.0, %v662_v17 }
  0xb2   : > { %v310_v19 = vmul.f32 0.5, %v309_v18 }
  0xb4   : > { %311 = vst [vmem:[%s260_s27] sm:$0xff] %v310_v19 }
  0xb5   : > { %805 = shalt.err (!%p802_p7)
}
  0xb6   : > { %s806_s9 = scalar_lea.hbm %s1169_s29, 128  ;;  %s810_s24 = scalar_lea.hbm %s1215_s2, 256 }
  0xb7   : > { %p807_p0 = scmp.ne.s32.totalorder %s1169_s29, %s806_s9  ;;  %p811_p5 = scmp.lt.u32.totalorder %s1169_s29, %s1215_s2 }
  0xb8   : > { %p812_p10 = scmp.lt.u32.totalorder %s810_s24, %s806_s9  ;;  %p814_p1 = scmp.lt.u32.totalorder %s806_s9, %s1169_s29 }
  0xb9   : > { %p808_p3 = pnand %p807_p0, %p1233_p9 }
  0xba   : > { %p813_p2 = por %p812_p10, %p811_p5 }
  0xbb   : > { %p809_p12 = pneg %p808_p3 }
  0xbc   : > { %p815_p6 = por %p814_p1, %p813_p2 }
  0xbe   : > { %p816_p13 = pnand %p815_p6, %p809_p12 }
  0xc0   : > { %819 = shalt.err (!%p816_p13)
}
  0xc1   : > { %589 = dma.vmem_to_hbm [thread:$0]  (%p1233_p9), %s1163_s7, 128, %s1169_s29, %s313_s8  }
  0xc2 PF: > { %s392_s27 = sand.u32 1, %s858_s18   ;;  %p1234_p4 = scmp.ne.s32.totalorder %s1223_s25, 0 }
  0xc3   : > { %p1235_p8 = scmp.ge.s32.totalorder %s870_s21, 2  ;;  %s393_s6 = scalar_lea.sflag [#allocation4], %s392_s27 }
  0xc5   : > { %p606_p11 = pnand %p1235_p8, %p1234_p4 }
  0xc7   : > { %845 = dma.done.wait (!%p606_p11), %s393_s6, 128  }
  0xc8   : > { %847 = vsyncadd (!%p606_p11), %s393_s6, 4294967168  ;;  %s401_s16 = sand.u32 1, %s555_s23  }
  0xc9   : > { %s402_s15 = scalar_lea.sflag [#allocation9], %s401_s16 }
  0xca   : > { %849 = dma.done.wait (!%p606_p11), %s402_s15, 256  }
  0xcb   : > { %851 = vsyncadd (!%p606_p11), %s402_s15, 4294967040  ;;  %s420_s13 = scalar_lea.sflag [#allocation12], %s392_s27 }
  0xcc   : > { %853 = dma.done.wait (!%p606_p11), %s420_s13, 128  }
  0xcd   : > { %855 = vsyncadd (!%p606_p11), %s420_s13, 4294967168  ;;  %p26_p9 = scmp.ge.s32.totalorder %s961_s30, 4   ;;  %s1236_s18 = smov %s862_s19 }
  0xce   : > { %s1237_s19 = smov %s866_s20  ;;  %s1238_s20 = smov %s985_s12 }
  0xcf   : > { %s1239_s21 = smov %s961_s30  ;;  %28 = sbr.rel (!%p26_p9) target bundleno = 10 (0xa), region = 127 }
  0xd6   :  { %425 = vsyncpa [#allocation3], 1 }
  0xd7   :  { %427 = vsyncpa [#allocation3 + $0x1], 1 }
  0xd8   :  { %428 = vsyncpa [#allocation4], 1 }
  0xd9   :  { %430 = vsyncpa [#allocation4 + $0x1], 1 }
  0xda   :  { %431 = vsyncpa [#allocation9], 1 }
  0xdb   :  { %433 = vsyncpa [#allocation9 + $0x1], 1 }
  0xdc   :  { %434 = vsyncpa [#allocation12], 1 }
  0xdd   :  { %436 = vsyncpa [#allocation12 + $0x1], 1 }
  0xde   :  { %437 = vsyncpa [#allocation5], 1 }
  0xdf   :  { %439 = vsyncpa [#allocation5 + $0x1], 1 }

</bundles_post_ra>
